<compile_context>
chip_gen: v6e
topology: v6e:2x2x1
jax: 0.10.0
libtpu: 0.0.40
codegen_flags: <defaults>
</compile_context>

<pallas_src>
import functools

import jax
import jax.numpy as jnp
from jax.experimental import pallas as pl
from jax.experimental.pallas import tpu as pltpu

ENC_DIMS = [128, 64, 32, 16, 8]
N_LAYERS = 10               # 5 encoder + 5 decoder linear layers
LATENT = ENC_DIMS[-1]       # 8
Z_PAD = 128                 # latent padded to a full 128-lane width


def _layer_dims(input_dims):
    dims = [input_dims] + ENC_DIMS                    # encoder chain
    dims = dims + ENC_DIMS[-2::-1] + [input_dims]     # decoder mirrors it back
    # dims = [D,128,64,32,16,8,16,32,64,128,D]
    return [(dims[i], dims[i + 1]) for i in range(N_LAYERS)]


def _round_up(n, m):
    return ((n + m - 1) // m) * m


def autoencoder_kernel(x_ref, *refs):
    """refs = (w0, b0, w1, b1, ..., w9, b9, recon_ref, z_ref)."""
    param_refs = refs[: 2 * N_LAYERS]
    recon_ref = refs[2 * N_LAYERS]
    z_ref = refs[2 * N_LAYERS + 1]

    h = x_ref[...]                                     # bf16 (TB, D)
    for i in range(N_LAYERS):
        w = param_refs[2 * i][...]                     # bf16 (in, out)
        b = param_refs[2 * i + 1][...]                 # f32  (1, out)
        # bf16 MXU inputs, f32 accumulate; bias add in f32.
        acc = jnp.dot(h, w, preferred_element_type=jnp.float32) + b
        if i < N_LAYERS - 1:
            a = jnp.maximum(acc, 0.0)                  # ReLU in f32 (v5e-safe)
            if i == 4:
                # Encoder output: lane-dense (TB, 128) store; cols >= 8 are 0.
                z_ref[...] = a.astype(z_ref.dtype)
            h = a.astype(jnp.bfloat16)                 # bf16 inter-layer storage
        else:
            # Numerically stable, exact sigmoid — result guaranteed in [0, 1].
            e = jnp.exp(-jnp.abs(acc))
            s = jnp.where(acc >= 0.0, 1.0 / (1.0 + e), e / (1.0 + e))
            recon_ref[...] = s.astype(recon_ref.dtype)


def init_params(input_dims, key):
    """PyTorch-style init U(-1/sqrt(fan_in), 1/sqrt(fan_in)).

    Weights stored bf16 (MXU inputs, half the DMA bytes); biases stay f32.
    """
    params = []
    for (fan_in, fan_out) in _layer_dims(input_dims):
        key, kw, kb = jax.random.split(key, 3)
        bound = 1.0 / jnp.sqrt(jnp.float32(fan_in))
        w = jax.random.uniform(kw, (fan_in, fan_out), jnp.float32, -bound, bound)
        b = jax.random.uniform(kb, (1, fan_out), jnp.float32, -bound, bound)
        params.extend([w.astype(jnp.bfloat16), b])
    return params


def _pad_latent_params(params):
    """Zero-pad the 8-wide latent boundary to 128 lanes.

    Padded bias entries are 0, so ReLU of the padded columns is 0, and the
    padded rows of the next layer's weight are 0 — numerically inert.
    """
    params = list(params)
    w4, b4, w5 = params[8], params[9], params[10]
    params[8] = jnp.pad(w4, ((0, 0), (0, Z_PAD - w4.shape[1])))
    params[9] = jnp.pad(b4, ((0, 0), (0, Z_PAD - b4.shape[1])))
    params[10] = jnp.pad(w5, ((0, Z_PAD - w5.shape[0]), (0, 0)))
    return params


@functools.partial(jax.jit, static_argnames=("block_b",))
def autoencoder_forward(x, params, *, block_b=1024):
    B, D = x.shape
    params = _pad_latent_params(params)
    param_bytes = sum(int(p.size) * p.dtype.itemsize for p in params)

    # ---- batch tile selection --------------------------------------------
    TB = min(block_b, _round_up(B, 8))
    # v7x has 2 TensorCores: keep >= 2 "parallel" grid steps when the batch
    # allows it so the second core is not idle (harmless on v5e/v6e).
    if _round_up(B, TB) // TB < 2:
        TB = max(8, _round_up(-(-B // 2), 8))
    # Conservative VMEM budget (fits v7x's 64 MiB physical / 32 MiB scoped):
    # bf16 x tiles (x2 bufs) + f32 recon tiles (x2) + f32 z tiles (x2)
    # + f32 working intermediates, plus the resident parameters.
    per_row_bytes = 4 * D + 8 * D + 8 * Z_PAD + 4 * (D + 2 * 128)
    budget = 24 * 1024 * 1024 - param_bytes
    tb_cap = max(8, (budget // per_row_bytes) // 8 * 8)
    TB = min(TB, tb_cap)
    B_pad = _round_up(B, TB)
    grid = (B_pad // TB,)

    # bf16 input stream: halves the x DMA and drops the first in-kernel cast.
    x = x.astype(jnp.bfloat16)
    if B_pad != B:
        x = jnp.pad(x, ((0, B_pad - B), (0, 0)))

    x_spec = pl.BlockSpec((TB, D), lambda i: (i, 0))
    recon_spec = pl.BlockSpec((TB, D), lambda i: (i, 0))
    z_spec = pl.BlockSpec((TB, Z_PAD), lambda i: (i, 0))
    # Weights/biases: full-extent blocks, constant index_map => fetched once,
    # VMEM-resident across all batch tiles.
    param_specs = [pl.BlockSpec(p.shape, lambda i: (0, 0)) for p in params]

    flops = 2 * B_pad * sum(
        int(params[2 * i].shape[0]) * int(params[2 * i].shape[1])
        for i in range(N_LAYERS))
    bytes_accessed = (param_bytes + B_pad * D * 2 + B_pad * D * 4
                      + B_pad * Z_PAD * 4)

    recon, z = pl.pallas_call(
        autoencoder_kernel,
        grid=grid,
        out_shape=(
            jax.ShapeDtypeStruct((B_pad, D), jnp.float32),      # recon_x
            jax.ShapeDtypeStruct((B_pad, Z_PAD), jnp.float32),  # z (lane-padded)
        ),
        in_specs=[x_spec] + param_specs,
        out_specs=(recon_spec, z_spec),
        compiler_params=pltpu.CompilerParams(
            dimension_semantics=("parallel",),
            vmem_limit_bytes=32 * 1024 * 1024,
        ),
        cost_estimate=pl.CostEstimate(
            flops=int(flops),
            transcendentals=int(B_pad * D),       # exp in the final sigmoid
            bytes_accessed=int(bytes_accessed),
        ),
    )(x, *params)

    recon = recon[:B]
    z = z[:B, :LATENT]
    return recon, z


if __name__ == "__main__":
    B = 8
    INPUT_DIMS = 256

    key = jax.random.PRNGKey(0)
    key, kx = jax.random.split(key)
    x = jax.random.uniform(kx, (B, INPUT_DIMS), jnp.float32)

    params = init_params(INPUT_DIMS, key)

    recon_x, z = autoencoder_forward(x, params)
    jax.block_until_ready(recon_x)
    jax.block_until_ready(z)

    assert recon_x.shape == (B, INPUT_DIMS)
    assert z.shape == (B, LATENT)
    assert bool(jnp.all(jnp.isfinite(recon_x)))
    assert bool(jnp.all((recon_x >= 0.0) & (recon_x <= 1.0)))  # exact sigmoid range
    assert bool(jnp.all(z >= 0.0))                             # encoder ends with ReLU

    print("KERNEL_OK")
</pallas_src>

<mosaic_0001>
module attributes {stable_mosaic.version = 11 : i64} {
  func.func @autoencoder_kernel(%arg0: i32, %arg1: memref<8x256xbf16, #tpu.memory_space<vmem>>, %arg2: memref<256x128xbf16, #tpu.memory_space<vmem>>, %arg3: memref<1x128xf32, #tpu.memory_space<vmem>>, %arg4: memref<128x64xbf16, #tpu.memory_space<vmem>>, %arg5: memref<1x64xf32, #tpu.memory_space<vmem>>, %arg6: memref<64x32xbf16, #tpu.memory_space<vmem>>, %arg7: memref<1x32xf32, #tpu.memory_space<vmem>>, %arg8: memref<32x16xbf16, #tpu.memory_space<vmem>>, %arg9: memref<1x16xf32, #tpu.memory_space<vmem>>, %arg10: memref<16x128xbf16, #tpu.memory_space<vmem>>, %arg11: memref<1x128xf32, #tpu.memory_space<vmem>>, %arg12: memref<128x16xbf16, #tpu.memory_space<vmem>>, %arg13: memref<1x16xf32, #tpu.memory_space<vmem>>, %arg14: memref<16x32xbf16, #tpu.memory_space<vmem>>, %arg15: memref<1x32xf32, #tpu.memory_space<vmem>>, %arg16: memref<32x64xbf16, #tpu.memory_space<vmem>>, %arg17: memref<1x64xf32, #tpu.memory_space<vmem>>, %arg18: memref<64x128xbf16, #tpu.memory_space<vmem>>, %arg19: memref<1x128xf32, #tpu.memory_space<vmem>>, %arg20: memref<128x256xbf16, #tpu.memory_space<vmem>>, %arg21: memref<1x256xf32, #tpu.memory_space<vmem>>, %arg22: memref<8x256xf32, #tpu.memory_space<vmem>>, %arg23: memref<8x128xf32, #tpu.memory_space<vmem>>) attributes {dimension_semantics = [#tpu.dimension_semantics<parallel>], iteration_bounds = array<i64: 1>, scalar_prefetch = 0 : i64, scratch_operands = 0 : i64, tpu.core_type = #tpu.core_type<tc>, window_params = [{transform_indices = @transform_0, window_bounds = array<i64: 8, 256>}, {pipeline_mode = #tpu.pipeline_mode<synchronous>, transform_indices = @transform_1, window_bounds = array<i64: 256, 128>}, {pipeline_mode = #tpu.pipeline_mode<synchronous>, transform_indices = @transform_2, window_bounds = array<i64: 1, 128>}, {pipeline_mode = #tpu.pipeline_mode<synchronous>, transform_indices = @transform_3, window_bounds = array<i64: 128, 64>}, {pipeline_mode = #tpu.pipeline_mode<synchronous>, transform_indices = @transform_4, window_bounds = array<i64: 1, 64>}, {pipeline_mode = #tpu.pipeline_mode<synchronous>, transform_indices = @transform_5, window_bounds = array<i64: 64, 32>}, {pipeline_mode = #tpu.pipeline_mode<synchronous>, transform_indices = @transform_6, window_bounds = array<i64: 1, 32>}, {pipeline_mode = #tpu.pipeline_mode<synchronous>, transform_indices = @transform_7, window_bounds = array<i64: 32, 16>}, {pipeline_mode = #tpu.pipeline_mode<synchronous>, transform_indices = @transform_8, window_bounds = array<i64: 1, 16>}, {pipeline_mode = #tpu.pipeline_mode<synchronous>, transform_indices = @transform_9, window_bounds = array<i64: 16, 128>}, {pipeline_mode = #tpu.pipeline_mode<synchronous>, transform_indices = @transform_10, window_bounds = array<i64: 1, 128>}, {pipeline_mode = #tpu.pipeline_mode<synchronous>, transform_indices = @transform_11, window_bounds = array<i64: 128, 16>}, {pipeline_mode = #tpu.pipeline_mode<synchronous>, transform_indices = @transform_12, window_bounds = array<i64: 1, 16>}, {pipeline_mode = #tpu.pipeline_mode<synchronous>, transform_indices = @transform_13, window_bounds = array<i64: 16, 32>}, {pipeline_mode = #tpu.pipeline_mode<synchronous>, transform_indices = @transform_14, window_bounds = array<i64: 1, 32>}, {pipeline_mode = #tpu.pipeline_mode<synchronous>, transform_indices = @transform_15, window_bounds = array<i64: 32, 64>}, {pipeline_mode = #tpu.pipeline_mode<synchronous>, transform_indices = @transform_16, window_bounds = array<i64: 1, 64>}, {pipeline_mode = #tpu.pipeline_mode<synchronous>, transform_indices = @transform_17, window_bounds = array<i64: 64, 128>}, {pipeline_mode = #tpu.pipeline_mode<synchronous>, transform_indices = @transform_18, window_bounds = array<i64: 1, 128>}, {pipeline_mode = #tpu.pipeline_mode<synchronous>, transform_indices = @transform_19, window_bounds = array<i64: 128, 256>}, {pipeline_mode = #tpu.pipeline_mode<synchronous>, transform_indices = @transform_20, window_bounds = array<i64: 1, 256>}, {transform_indices = @transform_21, window_bounds = array<i64: 8, 256>}, {transform_indices = @transform_22, window_bounds = array<i64: 8, 128>}]} {
    %c0 = arith.constant 0 : index
    %c0_0 = arith.constant 0 : index
    %0 = vector.load %arg1[%c0, %c0_0] : memref<8x256xbf16, #tpu.memory_space<vmem>>, vector<8x256xbf16>
    %c0_1 = arith.constant 0 : index
    %c0_2 = arith.constant 0 : index
    %1 = vector.load %arg2[%c0_1, %c0_2] : memref<256x128xbf16, #tpu.memory_space<vmem>>, vector<256x128xbf16>
    %c0_3 = arith.constant 0 : index
    %c0_4 = arith.constant 0 : index
    %2 = vector.load %arg3[%c0_3, %c0_4] : memref<1x128xf32, #tpu.memory_space<vmem>>, vector<1x128xf32>
    %cst = arith.constant dense<0.000000e+00> : vector<8x128xf32>
    %3 = tpu.matmul %0, %1, %cst {dimension_numbers = #tpu.dot_dimension_numbers<[1], [0], [0], [1], [0, 0, 1, 1], [], []>} : vector<8x256xbf16>, vector<256x128xbf16>, vector<8x128xf32> -> vector<8x128xf32>
    %4 = vector.broadcast %2 : vector<1x128xf32> to vector<8x128xf32>
    %5 = arith.addf %3, %4 : vector<8x128xf32>
    %cst_5 = arith.constant 0.000000e+00 : f32
    %6 = vector.broadcast %cst_5 : f32 to vector<8x128xf32>
    %7 = arith.maximumf %5, %6 : vector<8x128xf32>
    %8 = arith.truncf %7 : vector<8x128xf32> to vector<8x128xbf16>
    %c0_6 = arith.constant 0 : index
    %c0_7 = arith.constant 0 : index
    %9 = vector.load %arg4[%c0_6, %c0_7] : memref<128x64xbf16, #tpu.memory_space<vmem>>, vector<128x64xbf16>
    %c0_8 = arith.constant 0 : index
    %c0_9 = arith.constant 0 : index
    %10 = vector.load %arg5[%c0_8, %c0_9] : memref<1x64xf32, #tpu.memory_space<vmem>>, vector<1x64xf32>
    %cst_10 = arith.constant dense<0.000000e+00> : vector<8x64xf32>
    %11 = tpu.matmul %8, %9, %cst_10 {dimension_numbers = #tpu.dot_dimension_numbers<[1], [0], [0], [1], [0, 0, 1, 1], [], []>} : vector<8x128xbf16>, vector<128x64xbf16>, vector<8x64xf32> -> vector<8x64xf32>
    %12 = vector.broadcast %10 : vector<1x64xf32> to vector<8x64xf32>
    %13 = arith.addf %11, %12 : vector<8x64xf32>
    %cst_11 = arith.constant 0.000000e+00 : f32
    %14 = vector.broadcast %cst_11 : f32 to vector<8x64xf32>
    %15 = arith.maximumf %13, %14 : vector<8x64xf32>
    %16 = arith.truncf %15 : vector<8x64xf32> to vector<8x64xbf16>
    %c0_12 = arith.constant 0 : index
    %c0_13 = arith.constant 0 : index
    %17 = vector.load %arg6[%c0_12, %c0_13] : memref<64x32xbf16, #tpu.memory_space<vmem>>, vector<64x32xbf16>
    %c0_14 = arith.constant 0 : index
    %c0_15 = arith.constant 0 : index
    %18 = vector.load %arg7[%c0_14, %c0_15] : memref<1x32xf32, #tpu.memory_space<vmem>>, vector<1x32xf32>
    %cst_16 = arith.constant dense<0.000000e+00> : vector<8x32xf32>
    %19 = tpu.matmul %16, %17, %cst_16 {dimension_numbers = #tpu.dot_dimension_numbers<[1], [0], [0], [1], [0, 0, 1, 1], [], []>} : vector<8x64xbf16>, vector<64x32xbf16>, vector<8x32xf32> -> vector<8x32xf32>
    %20 = vector.broadcast %18 : vector<1x32xf32> to vector<8x32xf32>
    %21 = arith.addf %19, %20 : vector<8x32xf32>
    %cst_17 = arith.constant 0.000000e+00 : f32
    %22 = vector.broadcast %cst_17 : f32 to vector<8x32xf32>
    %23 = arith.maximumf %21, %22 : vector<8x32xf32>
    %24 = arith.truncf %23 : vector<8x32xf32> to vector<8x32xbf16>
    %c0_18 = arith.constant 0 : index
    %c0_19 = arith.constant 0 : index
    %25 = vector.load %arg8[%c0_18, %c0_19] : memref<32x16xbf16, #tpu.memory_space<vmem>>, vector<32x16xbf16>
    %c0_20 = arith.constant 0 : index
    %c0_21 = arith.constant 0 : index
    %26 = vector.load %arg9[%c0_20, %c0_21] : memref<1x16xf32, #tpu.memory_space<vmem>>, vector<1x16xf32>
    %cst_22 = arith.constant dense<0.000000e+00> : vector<8x16xf32>
    %27 = tpu.matmul %24, %25, %cst_22 {dimension_numbers = #tpu.dot_dimension_numbers<[1], [0], [0], [1], [0, 0, 1, 1], [], []>} : vector<8x32xbf16>, vector<32x16xbf16>, vector<8x16xf32> -> vector<8x16xf32>
    %28 = vector.broadcast %26 : vector<1x16xf32> to vector<8x16xf32>
    %29 = arith.addf %27, %28 : vector<8x16xf32>
    %cst_23 = arith.constant 0.000000e+00 : f32
    %30 = vector.broadcast %cst_23 : f32 to vector<8x16xf32>
    %31 = arith.maximumf %29, %30 : vector<8x16xf32>
    %32 = arith.truncf %31 : vector<8x16xf32> to vector<8x16xbf16>
    %c0_24 = arith.constant 0 : index
    %c0_25 = arith.constant 0 : index
    %33 = vector.load %arg10[%c0_24, %c0_25] : memref<16x128xbf16, #tpu.memory_space<vmem>>, vector<16x128xbf16>
    %c0_26 = arith.constant 0 : index
    %c0_27 = arith.constant 0 : index
    %34 = vector.load %arg11[%c0_26, %c0_27] : memref<1x128xf32, #tpu.memory_space<vmem>>, vector<1x128xf32>
    %cst_28 = arith.constant dense<0.000000e+00> : vector<8x128xf32>
    %35 = tpu.matmul %32, %33, %cst_28 {dimension_numbers = #tpu.dot_dimension_numbers<[1], [0], [0], [1], [0, 0, 1, 1], [], []>} : vector<8x16xbf16>, vector<16x128xbf16>, vector<8x128xf32> -> vector<8x128xf32>
    %36 = vector.broadcast %34 : vector<1x128xf32> to vector<8x128xf32>
    %37 = arith.addf %35, %36 : vector<8x128xf32>
    %cst_29 = arith.constant 0.000000e+00 : f32
    %38 = vector.broadcast %cst_29 : f32 to vector<8x128xf32>
    %39 = arith.maximumf %37, %38 : vector<8x128xf32>
    %c0_30 = arith.constant 0 : index
    %c0_31 = arith.constant 0 : index
    %40 = vector.load %arg23[%c0_30, %c0_31] : memref<8x128xf32, #tpu.memory_space<vmem>>, vector<8x128xf32>
    tpu.vector_store %arg23[%c0_30, %c0_31], %39 {strides = array<i32>} : memref<8x128xf32, #tpu.memory_space<vmem>>, vector<8x128xf32>,
    %41 = arith.truncf %39 : vector<8x128xf32> to vector<8x128xbf16>
    %c0_32 = arith.constant 0 : index
    %c0_33 = arith.constant 0 : index
    %42 = vector.load %arg12[%c0_32, %c0_33] : memref<128x16xbf16, #tpu.memory_space<vmem>>, vector<128x16xbf16>
    %c0_34 = arith.constant 0 : index
    %c0_35 = arith.constant 0 : index
    %43 = vector.load %arg13[%c0_34, %c0_35] : memref<1x16xf32, #tpu.memory_space<vmem>>, vector<1x16xf32>
    %cst_36 = arith.constant dense<0.000000e+00> : vector<8x16xf32>
    %44 = tpu.matmul %41, %42, %cst_36 {dimension_numbers = #tpu.dot_dimension_numbers<[1], [0], [0], [1], [0, 0, 1, 1], [], []>} : vector<8x128xbf16>, vector<128x16xbf16>, vector<8x16xf32> -> vector<8x16xf32>
    %45 = vector.broadcast %43 : vector<1x16xf32> to vector<8x16xf32>
    %46 = arith.addf %44, %45 : vector<8x16xf32>
    %cst_37 = arith.constant 0.000000e+00 : f32
    %47 = vector.broadcast %cst_37 : f32 to vector<8x16xf32>
    %48 = arith.maximumf %46, %47 : vector<8x16xf32>
    %49 = arith.truncf %48 : vector<8x16xf32> to vector<8x16xbf16>
    %c0_38 = arith.constant 0 : index
    %c0_39 = arith.constant 0 : index
    %50 = vector.load %arg14[%c0_38, %c0_39] : memref<16x32xbf16, #tpu.memory_space<vmem>>, vector<16x32xbf16>
    %c0_40 = arith.constant 0 : index
    %c0_41 = arith.constant 0 : index
    %51 = vector.load %arg15[%c0_40, %c0_41] : memref<1x32xf32, #tpu.memory_space<vmem>>, vector<1x32xf32>
    %cst_42 = arith.constant dense<0.000000e+00> : vector<8x32xf32>
    %52 = tpu.matmul %49, %50, %cst_42 {dimension_numbers = #tpu.dot_dimension_numbers<[1], [0], [0], [1], [0, 0, 1, 1], [], []>} : vector<8x16xbf16>, vector<16x32xbf16>, vector<8x32xf32> -> vector<8x32xf32>
    %53 = vector.broadcast %51 : vector<1x32xf32> to vector<8x32xf32>
    %54 = arith.addf %52, %53 : vector<8x32xf32>
    %cst_43 = arith.constant 0.000000e+00 : f32
    %55 = vector.broadcast %cst_43 : f32 to vector<8x32xf32>
    %56 = arith.maximumf %54, %55 : vector<8x32xf32>
    %57 = arith.truncf %56 : vector<8x32xf32> to vector<8x32xbf16>
    %c0_44 = arith.constant 0 : index
    %c0_45 = arith.constant 0 : index
    %58 = vector.load %arg16[%c0_44, %c0_45] : memref<32x64xbf16, #tpu.memory_space<vmem>>, vector<32x64xbf16>
    %c0_46 = arith.constant 0 : index
    %c0_47 = arith.constant 0 : index
    %59 = vector.load %arg17[%c0_46, %c0_47] : memref<1x64xf32, #tpu.memory_space<vmem>>, vector<1x64xf32>
    %cst_48 = arith.constant dense<0.000000e+00> : vector<8x64xf32>
    %60 = tpu.matmul %57, %58, %cst_48 {dimension_numbers = #tpu.dot_dimension_numbers<[1], [0], [0], [1], [0, 0, 1, 1], [], []>} : vector<8x32xbf16>, vector<32x64xbf16>, vector<8x64xf32> -> vector<8x64xf32>
    %61 = vector.broadcast %59 : vector<1x64xf32> to vector<8x64xf32>
    %62 = arith.addf %60, %61 : vector<8x64xf32>
    %cst_49 = arith.constant 0.000000e+00 : f32
    %63 = vector.broadcast %cst_49 : f32 to vector<8x64xf32>
    %64 = arith.maximumf %62, %63 : vector<8x64xf32>
    %65 = arith.truncf %64 : vector<8x64xf32> to vector<8x64xbf16>
    %c0_50 = arith.constant 0 : index
    %c0_51 = arith.constant 0 : index
    %66 = vector.load %arg18[%c0_50, %c0_51] : memref<64x128xbf16, #tpu.memory_space<vmem>>, vector<64x128xbf16>
    %c0_52 = arith.constant 0 : index
    %c0_53 = arith.constant 0 : index
    %67 = vector.load %arg19[%c0_52, %c0_53] : memref<1x128xf32, #tpu.memory_space<vmem>>, vector<1x128xf32>
    %cst_54 = arith.constant dense<0.000000e+00> : vector<8x128xf32>
    %68 = tpu.matmul %65, %66, %cst_54 {dimension_numbers = #tpu.dot_dimension_numbers<[1], [0], [0], [1], [0, 0, 1, 1], [], []>} : vector<8x64xbf16>, vector<64x128xbf16>, vector<8x128xf32> -> vector<8x128xf32>
    %69 = vector.broadcast %67 : vector<1x128xf32> to vector<8x128xf32>
    %70 = arith.addf %68, %69 : vector<8x128xf32>
    %cst_55 = arith.constant 0.000000e+00 : f32
    %71 = vector.broadcast %cst_55 : f32 to vector<8x128xf32>
    %72 = arith.maximumf %70, %71 : vector<8x128xf32>
    %73 = arith.truncf %72 : vector<8x128xf32> to vector<8x128xbf16>
    %c0_56 = arith.constant 0 : index
    %c0_57 = arith.constant 0 : index
    %74 = vector.load %arg20[%c0_56, %c0_57] : memref<128x256xbf16, #tpu.memory_space<vmem>>, vector<128x256xbf16>
    %c0_58 = arith.constant 0 : index
    %c0_59 = arith.constant 0 : index
    %75 = vector.load %arg21[%c0_58, %c0_59] : memref<1x256xf32, #tpu.memory_space<vmem>>, vector<1x256xf32>
    %cst_60 = arith.constant dense<0.000000e+00> : vector<8x256xf32>
    %76 = tpu.matmul %73, %74, %cst_60 {dimension_numbers = #tpu.dot_dimension_numbers<[1], [0], [0], [1], [0, 0, 1, 1], [], []>} : vector<8x128xbf16>, vector<128x256xbf16>, vector<8x256xf32> -> vector<8x256xf32>
    %77 = vector.broadcast %75 : vector<1x256xf32> to vector<8x256xf32>
    %78 = arith.addf %76, %77 : vector<8x256xf32>
    %79 = math.absf %78 : vector<8x256xf32>
    %cst_61 = arith.constant 0.000000e+00 : f32
    %80 = vector.broadcast %cst_61 : f32 to vector<8x256xf32>
    %81 = arith.subf %80, %79 : vector<8x256xf32>
    %82 = math.exp %81 : vector<8x256xf32>
    %cst_62 = arith.constant 0.000000e+00 : f32
    %83 = vector.broadcast %cst_62 : f32 to vector<8x256xf32>
    %84 = arith.cmpf oge, %78, %83 : vector<8x256xf32>
    %cst_63 = arith.constant 1.000000e+00 : f32
    %85 = vector.broadcast %cst_63 : f32 to vector<8x256xf32>
    %86 = arith.addf %85, %82 : vector<8x256xf32>
    %cst_64 = arith.constant 1.000000e+00 : f32
    %87 = vector.broadcast %cst_64 : f32 to vector<8x256xf32>
    %88 = arith.divf %87, %86 : vector<8x256xf32>
    %cst_65 = arith.constant 1.000000e+00 : f32
    %89 = vector.broadcast %cst_65 : f32 to vector<8x256xf32>
    %90 = arith.addf %89, %82 : vector<8x256xf32>
    %91 = arith.divf %82, %90 : vector<8x256xf32>
    %92 = arith.select %84, %88, %91 : vector<8x256xi1>, vector<8x256xf32>
    %c0_66 = arith.constant 0 : index
    %c0_67 = arith.constant 0 : index
    %93 = vector.load %arg22[%c0_66, %c0_67] : memref<8x256xf32, #tpu.memory_space<vmem>>, vector<8x256xf32>
    tpu.vector_store %arg22[%c0_66, %c0_67], %92 {strides = array<i32>} : memref<8x256xf32, #tpu.memory_space<vmem>>, vector<8x256xf32>,
    return
  }
  func.func @transform_0(%arg0: i32) -> (i32, i32) {
    %c0_i32 = arith.constant 0 : i32
    %c0_i32_0 = arith.constant 0 : i32
    return %arg0, %c0_i32 : i32, i32
  }
  func.func @transform_1(%arg0: i32) -> (i32, i32) {
    %c0_i32 = arith.constant 0 : i32
    %c0_i32_0 = arith.constant 0 : i32
    %c0_i32_1 = arith.constant 0 : i32
    return %c0_i32, %c0_i32_0 : i32, i32
  }
  func.func @transform_2(%arg0: i32) -> (i32, i32) {
    %c0_i32 = arith.constant 0 : i32
    %c0_i32_0 = arith.constant 0 : i32
    %c0_i32_1 = arith.constant 0 : i32
    return %c0_i32, %c0_i32_0 : i32, i32
  }
  func.func @transform_3(%arg0: i32) -> (i32, i32) {
    %c0_i32 = arith.constant 0 : i32
    %c0_i32_0 = arith.constant 0 : i32
    %c0_i32_1 = arith.constant 0 : i32
    return %c0_i32, %c0_i32_0 : i32, i32
  }
  func.func @transform_4(%arg0: i32) -> (i32, i32) {
    %c0_i32 = arith.constant 0 : i32
    %c0_i32_0 = arith.constant 0 : i32
    %c0_i32_1 = arith.constant 0 : i32
    return %c0_i32, %c0_i32_0 : i32, i32
  }
  func.func @transform_5(%arg0: i32) -> (i32, i32) {
    %c0_i32 = arith.constant 0 : i32
    %c0_i32_0 = arith.constant 0 : i32
    %c0_i32_1 = arith.constant 0 : i32
    return %c0_i32, %c0_i32_0 : i32, i32
  }
  func.func @transform_6(%arg0: i32) -> (i32, i32) {
    %c0_i32 = arith.constant 0 : i32
    %c0_i32_0 = arith.constant 0 : i32
    %c0_i32_1 = arith.constant 0 : i32
    return %c0_i32, %c0_i32_0 : i32, i32
  }
  func.func @transform_7(%arg0: i32) -> (i32, i32) {
    %c0_i32 = arith.constant 0 : i32
    %c0_i32_0 = arith.constant 0 : i32
    %c0_i32_1 = arith.constant 0 : i32
    return %c0_i32, %c0_i32_0 : i32, i32
  }
  func.func @transform_8(%arg0: i32) -> (i32, i32) {
    %c0_i32 = arith.constant 0 : i32
    %c0_i32_0 = arith.constant 0 : i32
    %c0_i32_1 = arith.constant 0 : i32
    return %c0_i32, %c0_i32_0 : i32, i32
  }
  func.func @transform_9(%arg0: i32) -> (i32, i32) {
    %c0_i32 = arith.constant 0 : i32
    %c0_i32_0 = arith.constant 0 : i32
    %c0_i32_1 = arith.constant 0 : i32
    return %c0_i32, %c0_i32_0 : i32, i32
  }
  func.func @transform_10(%arg0: i32) -> (i32, i32) {
    %c0_i32 = arith.constant 0 : i32
    %c0_i32_0 = arith.constant 0 : i32
    %c0_i32_1 = arith.constant 0 : i32
    return %c0_i32, %c0_i32_0 : i32, i32
  }
  func.func @transform_11(%arg0: i32) -> (i32, i32) {
    %c0_i32 = arith.constant 0 : i32
    %c0_i32_0 = arith.constant 0 : i32
    %c0_i32_1 = arith.constant 0 : i32
    return %c0_i32, %c0_i32_0 : i32, i32
  }
  func.func @transform_12(%arg0: i32) -> (i32, i32) {
    %c0_i32 = arith.constant 0 : i32
    %c0_i32_0 = arith.constant 0 : i32
    %c0_i32_1 = arith.constant 0 : i32
    return %c0_i32, %c0_i32_0 : i32, i32
  }
  func.func @transform_13(%arg0: i32) -> (i32, i32) {
    %c0_i32 = arith.constant 0 : i32
    %c0_i32_0 = arith.constant 0 : i32
    %c0_i32_1 = arith.constant 0 : i32
    return %c0_i32, %c0_i32_0 : i32, i32
  }
  func.func @transform_14(%arg0: i32) -> (i32, i32) {
    %c0_i32 = arith.constant 0 : i32
    %c0_i32_0 = arith.constant 0 : i32
    %c0_i32_1 = arith.constant 0 : i32
    return %c0_i32, %c0_i32_0 : i32, i32
  }
  func.func @transform_15(%arg0: i32) -> (i32, i32) {
    %c0_i32 = arith.constant 0 : i32
    %c0_i32_0 = arith.constant 0 : i32
    %c0_i32_1 = arith.constant 0 : i32
    return %c0_i32, %c0_i32_0 : i32, i32
  }
  func.func @transform_16(%arg0: i32) -> (i32, i32) {
    %c0_i32 = arith.constant 0 : i32
    %c0_i32_0 = arith.constant 0 : i32
    %c0_i32_1 = arith.constant 0 : i32
    return %c0_i32, %c0_i32_0 : i32, i32
  }
  func.func @transform_17(%arg0: i32) -> (i32, i32) {
    %c0_i32 = arith.constant 0 : i32
    %c0_i32_0 = arith.constant 0 : i32
    %c0_i32_1 = arith.constant 0 : i32
    return %c0_i32, %c0_i32_0 : i32, i32
  }
  func.func @transform_18(%arg0: i32) -> (i32, i32) {
    %c0_i32 = arith.constant 0 : i32
    %c0_i32_0 = arith.constant 0 : i32
    %c0_i32_1 = arith.constant 0 : i32
    return %c0_i32, %c0_i32_0 : i32, i32
  }
  func.func @transform_19(%arg0: i32) -> (i32, i32) {
    %c0_i32 = arith.constant 0 : i32
    %c0_i32_0 = arith.constant 0 : i32
    %c0_i32_1 = arith.constant 0 : i32
    return %c0_i32, %c0_i32_0 : i32, i32
  }
  func.func @transform_20(%arg0: i32) -> (i32, i32) {
    %c0_i32 = arith.constant 0 : i32
    %c0_i32_0 = arith.constant 0 : i32
    %c0_i32_1 = arith.constant 0 : i32
    return %c0_i32, %c0_i32_0 : i32, i32
  }
  func.func @transform_21(%arg0: i32) -> (i32, i32) {
    %c0_i32 = arith.constant 0 : i32
    %c0_i32_0 = arith.constant 0 : i32
    return %arg0, %c0_i32 : i32, i32
  }
  func.func @transform_22(%arg0: i32) -> (i32, i32) {
    %c0_i32 = arith.constant 0 : i32
    %c0_i32_0 = arith.constant 0 : i32
    return %arg0, %c0_i32 : i32, i32
  }
}

</mosaic_0001>

<bundles_post_ra>
// kernel: autoencoder_forward.1
= control target key start
LH: loop header
LB: loop body
LE: loop exit
PB: predicated region body
PF: predicated region fallthrough
CT: control target
= control target key end

     0   :  { %s2190_s0 = inlined_call_operand.vmem [shape: bf16[8,256], index: 0, kind: input, shape index: {}]   ;;  %s2191_s1 = inlined_call_operand.vmem [shape: bf16[256,128], index: 1, kind: input, shape index: {}]   ;;  %s2192_s2 = inlined_call_operand.hbm [shape: f32[1,128], index: 2, kind: input, shape index: {}]   ;;  %s2193_s3 = inlined_call_operand.vmem [shape: bf16[128,64], index: 3, kind: input, shape index: {}]   ;;  %s2194_s4 = inlined_call_operand.hbm [shape: f32[1,64], index: 4, kind: input, shape index: {}]   ;;  %s2195_s5 = inlined_call_operand.vmem [shape: bf16[64,32], index: 5, kind: input, shape index: {}]   ;;  %s2196_s6 = inlined_call_operand.hbm [shape: f32[1,32], index: 6, kind: input, shape index: {}]   ;;  %s2197_s7 = inlined_call_operand.vmem [shape: bf16[32,16], index: 7, kind: input, shape index: {}]   ;;  %s2198_s8 = inlined_call_operand.hbm [shape: f32[1,16], index: 8, kind: input, shape index: {}]   ;;  %s2199_s9 = inlined_call_operand.vmem [shape: bf16[16,128], index: 9, kind: input, shape index: {}]   ;;  %s2200_s10 = inlined_call_operand.vmem [shape: f32[1,128], index: 10, kind: input, shape index: {}]   ;;  %s2201_s11 = inlined_call_operand.vmem [shape: bf16[128,16], index: 11, kind: input, shape index: {}]   ;;  %s2202_s12 = inlined_call_operand.hbm [shape: f32[1,16], index: 12, kind: input, shape index: {}]   ;;  %s2203_s13 = inlined_call_operand.hbm [shape: bf16[16,32], index: 13, kind: input, shape index: {}]   ;;  %s2204_s14 = inlined_call_operand.hbm [shape: f32[1,32], index: 14, kind: input, shape index: {}]   ;;  %s2205_s15 = inlined_call_operand.hbm [shape: bf16[32,64], index: 15, kind: input, shape index: {}]   ;;  %s2206_s16 = inlined_call_operand.hbm [shape: f32[1,64], index: 16, kind: input, shape index: {}]   ;;  %s2207_s17 = inlined_call_operand.vmem [shape: bf16[64,128], index: 17, kind: input, shape index: {}]   ;;  %s2208_s18 = inlined_call_operand.vmem [shape: f32[1,128], index: 18, kind: input, shape index: {}]   ;;  %s2209_s19 = inlined_call_operand.vmem [shape: bf16[128,256], index: 19, kind: input, shape index: {}]   ;;  %s2210_s20 = inlined_call_operand.vmem [shape: f32[1,256], index: 20, kind: input, shape index: {}]   ;;  %s2211_s21 = inlined_call_operand.hbm [shape: f32[8,256], index: 21, kind: output, shape index: {0}]   ;;  %s2212_s22 = inlined_call_operand.hbm [shape: f32[8,128], index: 22, kind: output, shape index: {1}]  }
   0x1   :  { %2216 = sst [smem:[#allocation27_spill]] %s2190_s0 }
   0x2   :  { %2217 = sst [smem:[#allocation28_spill]] %s2191_s1 }
   0x3   :  { %2218 = sst [smem:[#allocation29_spill]] %s2192_s2 }
   0x4   :  { %2219 = sst [smem:[#allocation30_spill]] %s2193_s3 }
   0x5   :  { %2220 = sst [smem:[#allocation31_spill]] %s2194_s4 }
   0x6   :  { %2221 = sst [smem:[#allocation32_spill]] %s2195_s5 }
   0x7   :  { %2222 = sst [smem:[#allocation33_spill]] %s2196_s6 }
   0x8   :  { %28 = vsyncpa [#allocation3], 0 }
   0x9   :  { %29 = vsyncpa [#allocation6], 0 }
   0xa   :  { %30 = vsyncpa [#allocation9], 0 }
   0xb   :  { %31 = vsyncpa [#allocation12], 0 }
   0xc   :  { %32 = vsyncpa [#allocation15], 0 }
   0xd   :  { %33 = vsyncpa [#allocation4], 0 }
   0xe   :  { %34 = vsyncpa [#allocation19], 0  ;;  %s1785_s3 = smov [#allocation5]   ;;  %s1786_s29 = smov [#allocation8]  }
   0xf   :  { %s57_s28 = sshll.u32 %s1785_s3, 4  ;;  %s81_s30 = sshll.u32 %s1786_s29, 4  ;;  %s58_s28 = int_to_ptr.vmem [resolvable:$true] %s57_s28  ;;  %s82_s30 = int_to_ptr.vmem [resolvable:$true] %s81_s30 }
  0x10   :  { %s1559_s4 = scalar_lea.vmem %s58_s28, 16  ;;  %s1563_s0 = scalar_lea.vmem %s58_s28, 32 }
  0x11   :  { %p1560_p0 = scmp.ne.s32.totalorder %s58_s28, %s1559_s4  ;;  %p1564_p1 = scmp.lt.s32.totalorder %s58_s28, %s58_s28 }
  0x12   :  { %p1565_p2 = scmp.lt.s32.totalorder %s1563_s0, %s1559_s4 }
  0x14   :  { %p1566_p3 = por %p1565_p2, %p1564_p1 }
  0x16   :  { %p1567_p4 = pnand %p1566_p3, %p1560_p0 }
  0x18   :  { %1570 = shalt.err (!%p1567_p4)
}
  0x19   :  { %s2223_s5 = sld [smem:[#allocation31_spill]]  ;;  %s1579_s24 = scalar_lea.vmem %s82_s30, 16 }
  0x1a   :  { %p1580_p5 = scmp.ne.s32.totalorder %s82_s30, %s1579_s24  ;;  %s1583_s6 = scalar_lea.vmem %s82_s30, 32 }
  0x1b   :  { %p1584_p6 = scmp.lt.s32.totalorder %s82_s30, %s82_s30  ;;  %p1585_p7 = scmp.lt.s32.totalorder %s1583_s6, %s1579_s24 }
  0x1d   :  { %p1586_p8 = por %p1585_p7, %p1584_p6 }
  0x1f   :  { %60 = dma.hbm_to_vmem [thread:$0]  %s2223_s5, 16, %s58_s28, [#allocation6]  }
  0x20   :  { %p1587_p9 = pnand %p1586_p8, %p1580_p5 }
  0x22   :  { %1590 = shalt.err (!%p1587_p9)
}
  0x23   :  { %84 = dma.hbm_to_vmem [thread:$0]  %s2198_s8, 16, %s82_s30, [#allocation9]  }
  0x24   :  { %s1787_s2 = smov [#allocation11]  }
  0x25   :  { %s106_s27 = sshll.u32 %s1787_s2, 4  ;;  %s107_s27 = int_to_ptr.vmem [resolvable:$true] %s106_s27 }
  0x26   :  { %s1599_s3 = scalar_lea.vmem %s107_s27, 128  ;;  %p1604_p11 = scmp.lt.s32.totalorder %s107_s27, %s107_s27 }
  0x27   :  { %p1600_p10 = scmp.ne.s32.totalorder %s107_s27, %s1599_s3  ;;  %p1605_p12 = scmp.lt.s32.totalorder %s1599_s3, %s1599_s3 }
  0x29   :  { %p1606_p13 = por %p1605_p12, %p1604_p11 }
  0x2b   :  { %p1607_p0 = pnand %p1606_p13, %p1600_p10 }
  0x2d   :  { %1610 = shalt.err (!%p1607_p0)
}
  0x2e   :  { %s1788_s28 = smov 64   ;;  %s1789_s29 = smov 4  }
  0x2f   :  { %112 = dma.hbm_to_vmem [thread:$0]  %s2203_s13, 128, %s107_s27, [#allocation12], %s1788_s28, %s1788_s28, %s1789_s29  }
  0x30   :  { %s1790_s23 = smov [#allocation14]   ;;  %s1791_s8 = smov [#allocation2]  }
  0x31   :  { %s128_s1 = sshll.u32 %s1790_s23, 4  ;;  %s45_s30 = sshll.u32 %s1791_s8, 4  ;;  %s129_s1 = int_to_ptr.vmem [resolvable:$true] %s128_s1  ;;  %s46_s30 = int_to_ptr.vmem [resolvable:$true] %s45_s30 }
  0x32   :  { %s1619_s5 = scalar_lea.vmem %s129_s1, 256  ;;  %p1624_p2 = scmp.lt.s32.totalorder %s129_s1, %s129_s1 }
  0x33   :  { %p1620_p1 = scmp.ne.s32.totalorder %s129_s1, %s1619_s5  ;;  %p1625_p3 = scmp.lt.s32.totalorder %s1619_s5, %s1619_s5 }
  0x35   :  { %p1626_p4 = por %p1625_p3, %p1624_p2 }
  0x37   :  { %p1627_p5 = pnand %p1626_p4, %p1620_p1 }
  0x39   :  { %1630 = shalt.err (!%p1627_p5)
}
  0x3a   :  { %134 = dma.hbm_to_vmem [thread:$0]  %s2205_s15, 256, %s129_s1, [#allocation15], %s1788_s28, %s1788_s28, %s1789_s29  }
  0x3b   :  { %s1639_s25 = scalar_lea.vmem %s46_s30, 16  ;;  %s1643_s13 = scalar_lea.vmem %s46_s30, 32 }
  0x3c   :  { %p1640_p6 = scmp.ne.s32.totalorder %s46_s30, %s1639_s25  ;;  %p1644_p7 = scmp.lt.s32.totalorder %s46_s30, %s46_s30 }
  0x3d   :  { %p1645_p8 = scmp.lt.s32.totalorder %s1643_s13, %s1639_s25 }
  0x3f   :  { %p1646_p9 = por %p1645_p8, %p1644_p7 }
  0x41   :  { %p1647_p10 = pnand %p1646_p9, %p1640_p6 }
  0x43   :  { %1650 = shalt.err (!%p1647_p10)
}
  0x44   :  { %s2224_s27 = sld [smem:[#allocation29_spill]]  ;;  %s1792_s3 = smov [#allocation7]  }
  0x45   :  { %s69_s4 = sshll.u32 %s1792_s3, 4  ;;  %s1793_s0 = smov [#allocation10]   ;;  %s70_s4 = int_to_ptr.vmem [resolvable:$true] %s69_s4 }
  0x46   :  { %s97_s23 = sshll.u32 %s1793_s0, 4  ;;  %s1659_s8 = scalar_lea.vmem %s70_s4, 16  ;;  %s98_s23 = int_to_ptr.vmem [resolvable:$true] %s97_s23 }
  0x47   :  { %p1660_p11 = scmp.ne.s32.totalorder %s70_s4, %s1659_s8  ;;  %s1663_s15 = scalar_lea.vmem %s70_s4, 32 }
  0x48   :  { %p1664_p12 = scmp.lt.s32.totalorder %s70_s4, %s70_s4  ;;  %p1665_p13 = scmp.lt.s32.totalorder %s1663_s15, %s1659_s8 }
  0x4a   :  { %48 = dma.hbm_to_vmem [thread:$0]  %s2224_s27, 16, %s46_s30, [#allocation3]  }
  0x4b   :  { %p1666_p0 = por %p1665_p13, %p1664_p12 }
  0x4d   :  { %p1667_p1 = pnand %p1666_p0, %p1660_p11 }
  0x4f   :  { %1670 = shalt.err (!%p1667_p1)
}
  0x50   :  { %s2225_s1 = sld [smem:[#allocation33_spill]]  ;;  %s1679_s5 = scalar_lea.vmem %s98_s23, 16 }
  0x51   :  { %p1680_p2 = scmp.ne.s32.totalorder %s98_s23, %s1679_s5  ;;  %s1683_s30 = scalar_lea.vmem %s98_s23, 32 }
  0x52   :  { %p1684_p3 = scmp.lt.s32.totalorder %s98_s23, %s98_s23  ;;  %p1685_p4 = scmp.lt.s32.totalorder %s1683_s30, %s1679_s5 }
  0x54   :  { %p1686_p5 = por %p1685_p4, %p1684_p3 }
  0x56   :  { %72 = dma.hbm_to_vmem [thread:$0]  %s2225_s1, 16, %s70_s4, [#allocation6]  }
  0x57   :  { %p1687_p6 = pnand %p1686_p5, %p1680_p2 }
  0x59   :  { %1690 = shalt.err (!%p1687_p6)
}
  0x5a   :  { %100 = dma.hbm_to_vmem [thread:$0]  %s2202_s12, 16, %s98_s23, [#allocation9]  }
  0x5b   :  { %s1794_s25 = smov [#allocation13]   ;;  %s1795_s26 = smov [#allocation16]  }
  0x5c   :  { %s119_s13 = sshll.u32 %s1794_s25, 4  ;;  %s141_s2 = sshll.u32 %s1795_s26, 4  ;;  %s120_s13 = int_to_ptr.vmem [resolvable:$true] %s119_s13  ;;  %s142_s2 = int_to_ptr.vmem [resolvable:$true] %s141_s2 }
  0x5d   :  { %s1699_s27 = scalar_lea.vmem %s120_s13, 16  ;;  %s1703_s3 = scalar_lea.vmem %s120_s13, 32 }
  0x5e   :  { %p1700_p7 = scmp.ne.s32.totalorder %s120_s13, %s1699_s27  ;;  %p1704_p8 = scmp.lt.s32.totalorder %s120_s13, %s120_s13 }
  0x5f   :  { %p1705_p9 = scmp.lt.s32.totalorder %s1703_s3, %s1699_s27 }
  0x61   :  { %p1706_p10 = por %p1705_p9, %p1704_p8 }
  0x63   :  { %p1707_p11 = pnand %p1706_p10, %p1700_p7 }
  0x65   :  { %1710 = shalt.err (!%p1707_p11)
}
  0x66   :  { %122 = dma.hbm_to_vmem [thread:$0]  %s2204_s14, 16, %s120_s13, [#allocation12]  }
  0x67   :  { %s1719_s8 = scalar_lea.vmem %s142_s2, 16  ;;  %s1723_s12 = scalar_lea.vmem %s142_s2, 32 }
  0x68   :  { %p1720_p12 = scmp.ne.s32.totalorder %s142_s2, %s1719_s8  ;;  %p1724_p13 = scmp.lt.s32.totalorder %s142_s2, %s142_s2 }
  0x69   :  { %p1725_p0 = scmp.lt.s32.totalorder %s1723_s12, %s1719_s8 }
  0x6b   :  { %p1726_p1 = por %p1725_p0, %p1724_p13 }
  0x6d   :  { %p1727_p2 = pnand %p1726_p1, %p1720_p12 }
  0x6f   :  { %1730 = shalt.err (!%p1727_p2)
}
  0x70   :  { %144 = dma.hbm_to_vmem [thread:$0]  %s2206_s16, 16, %s142_s2, [#allocation15]  }
  0x71   :  { %1771 = dma.done.wait [#allocation3], 16  }
  0x72   :  { %1772 = vsyncadd [#allocation3], 4294967280 }
  0x73   :  { %1773 = dma.done.wait [#allocation6], 32  }
  0x74   :  { %1774 = vsyncadd [#allocation6], 4294967264 }
  0x75   :  { %1775 = dma.done.wait [#allocation9], 32  }
  0x76   :  { %1776 = vsyncadd [#allocation9], 4294967264 }
  0x77   :  { %1777 = dma.done.wait [#allocation12], 144  }
  0x78   :  { %1778 = vsyncadd [#allocation12], 4294967152 }
  0x79   :  { %1779 = dma.done.wait [#allocation15], 272  }
  0x7a   :  { %1780 = vsyncadd [#allocation15], 4294967024  ;;  %v1796_v0 = vmov 0.0   ;;  %s2226_s29 = sld [smem:[#allocation28_spill]]  ;;  %vm1797_vm0 = vmmov 0   ;;  %vm518_vm1 = vcmask 523264  }
  0x7b   :  { %1363 = vmatprep.subr.bf16.mxu1 %v1796_v0  ;;  %s2227_s16 = sld [smem:[#allocation27_spill]]  ;;  %1379 = vmatprep.mubr.msk.bf16.mxu1 %vm1797_vm0, %v1796_v0  ;;  %v1224_v29 = vld [vmem:[#allocation2] ss:$0 sm:$0xff]  ;;  %v1243_v41 = vld [vmem:[#allocation5] ss:$0 sm:$0xff]  ;;  %v1501_v47 = vld [vmem:[%s2197_s7 + $0x8] sm:$0xff]  }
  0x7c   :  { %s2228_s6 = sld [smem:[#allocation30_spill]]  ;;  %v1502_v50 = vld [vmem:[%s2197_s7] sm:$0xff]   ;;  %vm587_vm2 = vcmask 261120   ;;  %v1504_v60 = vld [vmem:[%s2201_s11 + $0x38] sm:$0xff]   ;;  %v1505_v61 = vld [vmem:[%s2201_s11 + $0x30] sm:$0xff]   ;;  %vm648_vm3 = vcmask 130048  }
  0x7d   :  { %s2229_s3 = sld [smem:[#allocation32_spill]]  ;;  %v1252_v51 = vld [vmem:[#allocation7] ss:$0 sm:$0xff]  ;;  %v1506_v62 = vld [vmem:[%s2201_s11 + $0x28] sm:$0xff]  }
  0x7e   :  { %v1503_v57 = vld [vmem:[%s2199_s9] sm:$0xff]  }
  0x7f   :  { %v1507_v63 = vld [vmem:[%s2201_s11 + $0x20] sm:$0xff]  }
  0x80   :  { %v1471_v1 = vld [vmem:[%s2226_s29 + $0x78] sm:$0xff]   ;;  %v1473_v3 = vld [vmem:[%s2226_s29 + $0x70] sm:$0xff]   ;;  %v1475_v5 = vld [vmem:[%s2226_s29 + $0x68] sm:$0xff]  }
  0x81   :  { %v1472_v2 = vld [vmem:[%s2226_s29 + $0x38] sm:$0xff]   ;;  %1303 = vmatprep.subr.bf16.mxu0 %v1471_v1  ;;  %v1474_v4 = vld [vmem:[%s2226_s29 + $0x30] sm:$0xff]   ;;  %v1476_v6 = vld [vmem:[%s2226_s29 + $0x28] sm:$0xff]  }
  0x82   :  { %1304 = vmatpush3.bf16.msra.mxu0 %v1472_v2  ;;  %v1477_v7 = vld [vmem:[%s2226_s29 + $0x60] sm:$0xff]   ;;  %v1479_v9 = vld [vmem:[%s2226_s29 + $0x58] sm:$0xff]   ;;  %v1481_v11 = vld [vmem:[%s2226_s29 + $0x50] sm:$0xff]  }
  0x83   :  { %1305 = vmatprep.subr.bf16.mxu0 %v1473_v3  ;;  %v1478_v8 = vld [vmem:[%s2226_s29 + $0x20] sm:$0xff]   ;;  %v1480_v10 = vld [vmem:[%s2226_s29 + $0x18] sm:$0xff]   ;;  %v1482_v15 = vld [vmem:[%s2226_s29 + $0x10] sm:$0xff]  }
  0x84   :  { %v181_v12 = vld [vmem:[%s2227_s16] sm:$0xff]  ;;  %v1489_v14 = vld [vmem:[%s2228_s6 + $0x38] sm:$0xff]   ;;  %v1483_v16 = vld [vmem:[%s2226_s29 + $0x48] sm:$0xff]  }
  0x85   :  { %v1226_v13 = vcombine.high %v181_v12, %v181_v12  ;;  %1364 = vmatpush3.bf16.msra.mxu1 %v1489_v14  ;;  %v1490_v17 = vld [vmem:[%s2228_s6 + $0x30] sm:$0xff]   ;;  %v1484_v18 = vld [vmem:[%s2226_s29 + $0x8] sm:$0xff]   ;;  %v1485_v19 = vld [vmem:[%s2226_s29 + $0x40] sm:$0xff]   ;;  %v1225_v23 = vcombine.low %v181_v12, %v181_v12 }
  0x86   :  { %1306 = vmatpush3.bf16.msra.mxu0 %v1474_v4  ;;  %1365 = vmatprep.subr.bf16.mxu1 %v1796_v0  ;;  %v1491_v20 = vld [vmem:[%s2228_s6 + $0x28] sm:$0xff]   ;;  %v1486_v21 = vld [vmem:[%s2226_s29] sm:$0xff]   ;;  %v1493_v24 = vld [vmem:[%s2228_s6 + $0x18] sm:$0xff]  }
  0x87   :  { %1307 = vmatprep.subr.bf16.mxu0 %v1475_v5  ;;  %356 = vmatprep.mubr.bf16.mxu0 %v1226_v13  ;;  %v1492_v22 = vld [vmem:[%s2228_s6 + $0x20] sm:$0xff]   ;;  %v1494_v25 = vld [vmem:[%s2228_s6 + $0x10] sm:$0xff]   ;;  %v1495_v26 = vld [vmem:[%s2228_s6 + $0x8] sm:$0xff]  }
  0x88   :  { %v1496_v27 = vld [vmem:[%s2228_s6] sm:$0xff]   ;;  %v1497_v36 = vld [vmem:[%s2229_s3 + $0x18] sm:$0xff]   ;;  %v1498_v38 = vld [vmem:[%s2229_s3 + $0x10] sm:$0xff]  }
  0x89   :  { %1366 = vmatpush3.bf16.msra.mxu1 %v1490_v17  ;;  %v1499_v39 = vld [vmem:[%s2229_s3 + $0x8] sm:$0xff]   ;;  %v1500_v40 = vld [vmem:[%s2229_s3] sm:$0xff]   ;;  %v1508_v1 = vld [vmem:[%s2201_s11 + $0x18] sm:$0xff]  }
  0x8a   :  { %1308 = vmatpush3.bf16.msra.mxu0 %v1476_v6  ;;  %1367 = vmatprep.subr.bf16.mxu1 %v1796_v0  ;;  %v1509_v2 = vld [vmem:[%s2201_s11 + $0x10] sm:$0xff]   ;;  %v1258_v3 = vld [vmem:[#allocation8] ss:$0 sm:$0xff]  ;;  %v1262_v14 = vld [vmem:[%s2200_s10] ss:$0 sm:$0xff] }
  0x8b   :  { %1309 = vmatprep.subr.bf16.mxu0 %v1477_v7  ;;  %v1511_v12 = vld [vmem:[%s2201_s11] sm:$0xff]   ;;  %v1512_v13 = vld [vmem:[#allocation11] sm:$0xff]  }
  0x8d   :  { %1368 = vmatpush3.bf16.msra.mxu1 %v1491_v20 }
  0x8e   :  { %1310 = vmatpush3.bf16.msra.mxu0 %v1478_v8  ;;  %1369 = vmatprep.subr.bf16.mxu1 %v1796_v0 }
  0x8f   :  { %1311 = vmatprep.subr.bf16.mxu0 %v1479_v9 }
  0x91   :  { %1370 = vmatpush3.bf16.msra.mxu1 %v1492_v22  ;;  %v1265_v22 = vld [vmem:[#allocation10] ss:$0 sm:$0xff] }
  0x92   :  { %1312 = vmatpush3.bf16.msra.mxu0 %v1480_v10  ;;  %1371 = vmatprep.subr.bf16.mxu1 %v1796_v0 }
  0x93   :  { %1313 = vmatprep.subr.bf16.mxu0 %v1481_v11  ;;  %v1510_v11 = vld [vmem:[%s2201_s11 + $0x8] sm:$0xff]  }
  0x95   :  { %1372 = vmatpush3.bf16.msra.mxu1 %v1493_v24 }
  0x96   :  { %1314 = vmatpush3.bf16.msra.mxu0 %v1482_v15  ;;  %1373 = vmatprep.subr.bf16.mxu1 %v1796_v0 }
  0x97   :  { %1315 = vmatprep.subr.bf16.mxu0 %v1483_v16 }
  0x99   :  { %1374 = vmatpush3.bf16.msra.mxu1 %v1494_v25 }
  0x9a   :  { %1316 = vmatpush3.bf16.msra.mxu0 %v1484_v18  ;;  %1375 = vmatprep.subr.bf16.mxu1 %v1796_v0 }
  0x9b   :  { %1317 = vmatprep.subr.bf16.mxu0 %v1485_v19 }
  0x9d   :  { %1376 = vmatpush3.bf16.msra.mxu1 %v1495_v26 }
  0x9e   :  { %1318 = vmatpush3.bf16.msra.mxu0 %v1486_v21  ;;  %1377 = vmatprep.subr.bf16.mxu1 %v1796_v0 }
  0x9f   :  { %1409 = vmatprep.subr.bf16.mxu0 %v1796_v0 }
  0xa1   :  { %357 = vmatmul.mubr.bf16.vlgmr.msra.gmra.mxu0 %v1225_v23  ;;  %1378 = vmatpush3.bf16.msra.mxu1 %v1496_v27 }
  0xa2   :  { %1383 = vmatprep.subr.bf16.mxu1 %v1796_v0  ;;  %1425 = vmatprep.mubr.msk.bf16.mxu0 %vm1797_vm0, %v1796_v0 }
  0xa3   :  { %1410 = vmatpush3.bf16.msra.mxu0 %v1504_v60 }
  0xa4   :  { %1411 = vmatprep.subr.bf16.mxu0 %v1796_v0 }
  0xa7   :  { %1412 = vmatpush3.bf16.msra.mxu0 %v1505_v61 }
  0xa8   :  { %1413 = vmatprep.subr.bf16.mxu0 %v1796_v0 }
  0xab   :  { %1414 = vmatpush3.bf16.msra.mxu0 %v1506_v62 }
  0xac   :  { %1415 = vmatprep.subr.bf16.mxu0 %v1796_v0 }
  0xaf   :  { %1416 = vmatpush3.bf16.msra.mxu0 %v1507_v63 }
  0xb0   :  { %1417 = vmatprep.subr.bf16.mxu0 %v1796_v0 }
  0xb3   :  { %1418 = vmatpush3.bf16.msra.mxu0 %v1508_v1 }
  0xb4   :  { %1419 = vmatprep.subr.bf16.mxu0 %v1796_v0 }
  0xb7   :  { %1420 = vmatpush3.bf16.msra.mxu0 %v1509_v2  ;;  %v1542_v2 = vld [vmem:[%s2209_s19 + $0x4] ss:$8 sps:$4 sm:$0xff]  }
  0xb8   :  { %1421 = vmatprep.subr.bf16.mxu0 %v1796_v0 }
  0xbb   :  { %1422 = vmatpush3.bf16.msra.mxu0 %v1510_v11 }
  0xbc   :  { %1423 = vmatprep.subr.bf16.mxu0 %v1796_v0 }
  0xbf   :  { %1424 = vmatpush3.bf16.msra.mxu0 %v1511_v12 }
 0x161   :  { %v1319_v28 = vpop.f32.mrf.mxu0 }
 0x163   :  { %v1320_v30 = vpop.f32.mrf.mxu0 }
 0x164   :  { %v1321_v31 = vadd.f32 %v1320_v30, %v1319_v28  ;;  %v1513_v28 = vld [vmem:[#allocation14 + $0x8] sm:$0xff]  }
 0x165   :  { %v1322_v32 = vpop.f32.mrf.mxu0 }
 0x166   :  { %v359_v33 = vadd.f32 %v1321_v31, %v1224_v29  ;;  %v1514_v31 = vld [vmem:[#allocation14] sm:$0xff]   ;;  %v1274_v32 = vld [vmem:[#allocation13] ss:$0 sm:$0xff] }
 0x167   :  { %v1323_v34 = vpop.f32.mrf.mxu0 }
 0x168   :  { %v364_v35 = vmax.f32 %v359_v33, 0.0 }
 0x16a   :  { %v365_v37 = vpack.c.bf16 %v364_v35, %v364_v35 }
 0x16c   :  { %1380 = vmatmul.mubr.bf16.vlgmr.msra.gmra.mxu1 %v365_v37 }
 0x16d   :  { %1384 = vmatpush3.bf16.msra.mxu1 %v1497_v36  ;;  %1391 = vmatprep.mubr.msk.bf16.mxu1 %vm1797_vm0, %v1796_v0 }
 0x16e   :  { %1385 = vmatprep.subr.bf16.mxu1 %v1796_v0 }
 0x171   :  { %1386 = vmatpush3.bf16.msra.mxu1 %v1498_v38  ;;  %v1515_v38 = vld [vmem:[%s2207_s17 + $0x18] sm:$0xff]  }
 0x172   :  { %1387 = vmatprep.subr.bf16.mxu1 %v1796_v0 }
 0x175   :  { %1388 = vmatpush3.bf16.msra.mxu1 %v1499_v39 }
 0x176   :  { %1389 = vmatprep.subr.bf16.mxu1 %v1796_v0 }
 0x179   :  { %1390 = vmatpush3.bf16.msra.mxu1 %v1500_v40 }
 0x17a   :  { %1395 = vmatprep.subr.bf16.mxu1 %v1796_v0 }
 0x22c   :  { %v471_v42 = vpop.f32.mrf.mxu1 }
 0x22d   :  { %v472_v43 = vadd.f32 %v1243_v41, %v471_v42  ;;  %v1516_v41 = vld [vmem:[%s2207_s17 + $0x10] sm:$0xff]   ;;  %v1517_v42 = vld [vmem:[%s2207_s17 + $0x8] sm:$0xff]  }
 0x22e   :  { %v1381_v44 = vpop.f32.mrf.mxu1 }
 0x22f   :  { %v477_v45 = vmax.f32 %v472_v43, 0.0  ;;  %v1518_v43 = vld [vmem:[%s2207_s17] sm:$0xff]   ;;  %v1519_v44 = vld [vmem:[%s2209_s19 + $0x70] ss:$8 sps:$4 sm:$0xff]   ;;  %s1799_s17 = smov [#allocation18]  }
 0x230   :  { %v474_v46 = vpop.f32.mrf.mxu1  ;;  %s1207_s6 = sshll.u32 %s1799_s17, 4  ;;  %s1208_s6 = int_to_ptr.vmem [resolvable:$true] %s1207_s6 }
 0x231   :  { %v478_v48 = vpack.c.bf16 %v477_v45, %v477_v45  ;;  %v1521_v45 = vld [vmem:[%s2209_s19 + $0x74] ss:$8 sps:$4 sm:$0xff]   ;;  %v1524_v46 = vld [vmem:[%s2209_s19 + $0x64] ss:$8 sps:$4 sm:$0xff]   ;;  %p1736_p4 = scmp.lt.s32.totalorder %s1208_s6, %s1208_s6 }
 0x232   :  { %v1382_v49 = vpop.f32.mrf.mxu1  ;;  %1128 = vmatprep.subr.bf16.mxu0 %v1521_v45 }
 0x233   :  { %1392 = vmatmul.mubr.msk.bf16.vlgmr.msra.gmra.mxu1 %vm518_vm1, %v478_v48  ;;  %v1525_v48 = vld [vmem:[%s2209_s19 + $0x50] ss:$8 sps:$4 sm:$0xff]   ;;  %v1530_v49 = vld [vmem:[%s2209_s19 + $0x44] ss:$8 sps:$4 sm:$0xff]  }
 0x234   :  { %1396 = vmatpush3.bf16.msra.mxu1 %v1501_v47  ;;  %1399 = vmatprep.mubr.msk.bf16.mxu1 %vm1797_vm0, %v1796_v0  ;;  %v1527_v47 = vld [vmem:[%s2209_s19 + $0x54] ss:$8 sps:$4 sm:$0xff]  }
 0x235   :  { %1397 = vmatprep.subr.bf16.mxu1 %v1796_v0 }
 0x238   :  { %1398 = vmatpush3.bf16.msra.mxu1 %v1502_v50  ;;  %v1528_v50 = vld [vmem:[%s2209_s19 + $0x40] ss:$8 sps:$4 sm:$0xff]  }
 0x239   :  { %1403 = vmatprep.subr.bf16.mxu1 %v1796_v0 }
 0x2f3   :  { %v556_v52 = vpop.f32.mrf.mxu1 }
 0x2f4   :  { %v557_v53 = vadd.f32 %v1252_v51, %v556_v52  ;;  %v1533_v51 = vld [vmem:[%s2209_s19 + $0x34] ss:$8 sps:$4 sm:$0xff]   ;;  %v1531_v52 = vld [vmem:[%s2209_s19 + $0x30] ss:$8 sps:$4 sm:$0xff]  }
 0x2f5   :  { %v1393_v54 = vpop.f32.mrf.mxu1 }
 0x2f6   :  { %v562_v55 = vmax.f32 %v557_v53, 0.0  ;;  %v1536_v53 = vld [vmem:[%s2209_s19 + $0x24] ss:$8 sps:$4 sm:$0xff]   ;;  %v1534_v54 = vld [vmem:[%s2209_s19 + $0x20] ss:$8 sps:$4 sm:$0xff]  }
 0x2f7   :  { %v559_v56 = vpop.f32.mrf.mxu1 }
 0x2f8   :  { %v563_v58 = vpack.c.bf16 %v562_v55, %v562_v55  ;;  %v1539_v55 = vld [vmem:[%s2209_s19 + $0x14] ss:$8 sps:$4 sm:$0xff]   ;;  %v1537_v56 = vld [vmem:[%s2209_s19 + $0x10] ss:$8 sps:$4 sm:$0xff]  }
 0x2f9   :  { %v1394_v59 = vpop.f32.mrf.mxu1 }
 0x2fa   :  { %1400 = vmatmul.mubr.msk.bf16.vlgmr.msra.gmra.mxu1 %vm587_vm2, %v563_v58 }
 0x2fb   :  { %1404 = vmatpush3.bf16.msra.mxu1 %v1503_v57  ;;  %1405 = vmatprep.mubr.msk.bf16.mxu1 %vm1797_vm0, %v1796_v0  ;;  %v1277_v57 = vld [vmem:[#allocation16] ss:$0 sm:$0xff] }
 0x2fc   :  { %1429 = vmatprep.subr.bf16.mxu1 %v1796_v0 }
 0x3ba   :  { %v625_v4 = vpop.f32.mrf.mxu1 }
 0x3bb   :  { %v626_v5 = vadd.f32 %v1258_v3, %v625_v4  ;;  %v1540_v3 = vld [vmem:[%s2209_s19] ss:$8 sps:$4 sm:$0xff]   ;;  %v1798_v4 = vmov 0  }
 0x3bc   :  { %v1401_v6 = vpop.f32.mrf.mxu1 }
 0x3bd   :  { %v631_v7 = vmax.f32 %v626_v5, 0.0  ;;  %v1281_v5 = vld [vmem:[%s2208_s18] ss:$0 sm:$0xff] }
 0x3be   :  { %v628_v8 = vpop.f32.mrf.mxu1 }
 0x3bf   :  { %v632_v9 = vpack.c.bf16 %v631_v7, %v631_v7 }
 0x3c0   :  { %v1402_v10 = vpop.f32.mrf.mxu1 }
 0x3c1   :  { %1406 = vmatmul.mubr.msk.bf16.vlgmr.msra.gmra.mxu1 %vm648_vm3, %v632_v9 }
 0x3c2   :  { %1431 = vmatprep.mubr.msk.bf16.mxu1 %vm1797_vm0, %v1796_v0  ;;  %1430 = vmatpush3.bf16.msra.mxu1 %v1512_v13 }
 0x3c3   :  { %1435 = vmatprep.subr.bf16.mxu1 %v1796_v0 }
 0x481   :  { %v686_v15 = vpop.f32.mrf.mxu1 }
 0x482   :  { %v687_v16 = vadd.f32 %v1262_v14, %v686_v15 }
 0x483   :  { %v1407_v17 = vpop.f32.mrf.mxu1 }
 0x484   :  { %v692_v18 = vmax.f32 %v687_v16, 0.0 }
 0x485   :  { %v689_v19 = vpop.f32.mrf.mxu1 }
 0x486   :  { %v694_v20 = vpack.c.bf16 %v692_v18, %v692_v18  ;;  %693 = vst [vmem:[#allocation18] sm:$0xff] %v692_v18 }
 0x487   :  { %v1408_v21 = vpop.f32.mrf.mxu1 }
 0x488   :  { %1426 = vmatmul.mubr.bf16.vlgmr.msra.gmra.mxu0 %v694_v20 }
 0x489   :  { %1129 = vmatpush1.bf16.msra.mxu0 %v1519_v44  ;;  %1160 = vmatprep.mubr.bf16.mxu0 %v1798_v4 }
 0x48a   :  { %1130 = vmatprep.subr.bf16.mxu0 %v1524_v46 }
 0x548   :  { %v800_v23 = vpop.f32.mrf.mxu0 }
 0x549   :  { %v801_v24 = vadd.f32 %v1265_v22, %v800_v23 }
 0x54a   :  { %v1427_v25 = vpop.f32.mrf.mxu0 }
 0x54b   :  { %v806_v26 = vmax.f32 %v801_v24, 0.0 }
 0x54c   :  { %v803_v27 = vpop.f32.mrf.mxu0 }
 0x54d   :  { %v807_v29 = vpack.c.bf16 %v806_v26, %v806_v26 }
 0x54e   :  { %v1428_v30 = vpop.f32.mrf.mxu0 }
 0x54f   :  { %1432 = vmatmul.mubr.msk.bf16.vlgmr.msra.gmra.mxu1 %vm648_vm3, %v807_v29 }
 0x550   :  { %1436 = vmatpush3.bf16.msra.mxu1 %v1513_v28  ;;  %1439 = vmatprep.mubr.msk.bf16.mxu1 %vm1797_vm0, %v1796_v0 }
 0x551   :  { %1437 = vmatprep.subr.bf16.mxu1 %v1796_v0 }
 0x554   :  { %1438 = vmatpush3.bf16.msra.mxu1 %v1514_v31 }
 0x555   :  { %1443 = vmatprep.subr.bf16.mxu1 %v1796_v0 }
 0x60f   :  { %v860_v33 = vpop.f32.mrf.mxu1 }
 0x610   :  { %v861_v34 = vadd.f32 %v1274_v32, %v860_v33 }
 0x611   :  { %v1433_v35 = vpop.f32.mrf.mxu1 }
 0x612   :  { %v866_v36 = vmax.f32 %v861_v34, 0.0 }
 0x613   :  { %v863_v37 = vpop.f32.mrf.mxu1 }
 0x614   :  { %v867_v39 = vpack.c.bf16 %v866_v36, %v866_v36 }
 0x615   :  { %v1434_v40 = vpop.f32.mrf.mxu1 }
 0x616   :  { %1440 = vmatmul.mubr.msk.bf16.vlgmr.msra.gmra.mxu1 %vm587_vm2, %v867_v39 }
 0x617   :  { %1444 = vmatpush3.bf16.msra.mxu1 %v1515_v38  ;;  %1451 = vmatprep.mubr.msk.bf16.mxu1 %vm1797_vm0, %v1796_v0 }
 0x618   :  { %1445 = vmatprep.subr.bf16.mxu1 %v1796_v0 }
 0x61b   :  { %1446 = vmatpush3.bf16.msra.mxu1 %v1516_v41 }
 0x61c   :  { %1447 = vmatprep.subr.bf16.mxu1 %v1796_v0 }
 0x61f   :  { %1448 = vmatpush3.bf16.msra.mxu1 %v1517_v42 }
 0x620   :  { %1449 = vmatprep.subr.bf16.mxu1 %v1796_v0  ;;  %v1522_v0 = vld [vmem:[%s2209_s19 + $0x60] ss:$8 sps:$4 sm:$0xff]   ;;  %s1731_s19 = scalar_lea.vmem %s1208_s6, 128 }
 0x621   :  { %1131 = vmatpush1.bf16.msra.mxu0 %v1522_v0  ;;  %p1732_p3 = scmp.ne.s32.totalorder %s1208_s6, %s1731_s19  ;;  %p1737_p5 = scmp.lt.s32.totalorder %s1731_s19, %s1731_s19 }
 0x622   :  { %1132 = vmatprep.subr.bf16.mxu0 %v1527_v47 }
 0x623   :  { %1450 = vmatpush3.bf16.msra.mxu1 %v1518_v43  ;;  %p1738_p6 = por %p1737_p5, %p1736_p4 }
 0x625   :  { %1133 = vmatpush1.bf16.msra.mxu0 %v1525_v48  ;;  %p1739_p7 = pnand %p1738_p6, %p1732_p3 }
 0x626   :  { %1134 = vmatprep.subr.bf16.mxu0 %v1530_v49 }
 0x629   :  { %1135 = vmatpush1.bf16.msra.mxu0 %v1528_v50 }
 0x62a   :  { %1136 = vmatprep.subr.bf16.mxu0 %v1533_v51 }
 0x62d   :  { %1137 = vmatpush1.bf16.msra.mxu0 %v1531_v52 }
 0x62e   :  { %1138 = vmatprep.subr.bf16.mxu0 %v1536_v53 }
 0x631   :  { %1139 = vmatpush1.bf16.msra.mxu0 %v1534_v54 }
 0x632   :  { %1140 = vmatprep.subr.bf16.mxu0 %v1539_v55 }
 0x635   :  { %1141 = vmatpush1.bf16.msra.mxu0 %v1537_v56 }
 0x636   :  { %1142 = vmatprep.subr.bf16.mxu0 %v1542_v2 }
 0x639   :  { %1143 = vmatpush1.bf16.msra.mxu0 %v1540_v3 }
 0x6d6   :  { %v928_v58 = vpop.f32.mrf.mxu1 }
 0x6d7   :  { %v929_v59 = vadd.f32 %v1277_v57, %v928_v58 }
 0x6d8   :  { %v1441_v60 = vpop.f32.mrf.mxu1 }
 0x6d9   :  { %v934_v61 = vmax.f32 %v929_v59, 0.0 }
 0x6da   :  { %v931_v62 = vpop.f32.mrf.mxu1 }
 0x6db   :  { %v935_v63 = vpack.c.bf16 %v934_v61, %v934_v61 }
 0x6dc   :  { %v1442_v1 = vpop.f32.mrf.mxu1 }
 0x6dd   :  { %1452 = vmatmul.mubr.msk.bf16.vlgmr.msra.gmra.mxu1 %vm518_vm1, %v935_v63 }
 0x79d   :  { %v1012_v6 = vpop.f32.mrf.mxu1 }
 0x79e   :  { %v1013_v7 = vadd.f32 %v1281_v5, %v1012_v6 }
 0x79f   :  { %v1453_v8 = vpop.f32.mrf.mxu1 }
 0x7a0   :  { %v1018_v9 = vmax.f32 %v1013_v7, 0.0 }
 0x7a1   :  { %v1015_v10 = vpop.f32.mrf.mxu1 }
 0x7a2   :  { %v1019_v11 = vpack.c.bf16 %v1018_v9, %v1018_v9 }
 0x7a3   :  { %v1454_v12 = vpop.f32.mrf.mxu1 }
 0x7a4   :  { %1161 = vmatmul.mubr.bf16.vlgmr.msra.gmra.mxu0 %v1019_v11 }
 0x7a5   :  { %1742 = shalt.err (!%p1739_p7)
}
 0x7a6   :  { %1210 = dma.vmem_to_hbm [thread:$0]  %s1208_s6, 128, %s2212_s22, [#allocation19]   ;;  %v1038_v13 = vlaneseq  ;;  %v1036_v16 = vld [vmem:[%s2210_s20] sm:$0x3] }
 0x7a7   :  { %s1800_s20 = smov [#allocation17]  }
 0x7a8   :  { %v1039_v14 = vshrl.u32 %v1038_v13, 7  ;;  %s1197_s22 = sshll.u32 %s1800_s20, 4  ;;  %s1198_s22 = int_to_ptr.vmem [resolvable:$true] %s1197_s22 }
 0x7a9   :  { %s1751_s8 = scalar_lea.vmem %s1198_s22, 256  ;;  %p1756_p9 = scmp.lt.s32.totalorder %s1198_s22, %s1198_s22 }
 0x7aa   :  { %v1040_v15 = vsub.s32 0, %v1039_v14  ;;  %v1044_v17 = vsub.s32 1, %v1039_v14  ;;  %p1752_p8 = scmp.ne.s32.totalorder %s1198_s22, %s1751_s8  ;;  %p1757_p10 = scmp.lt.s32.totalorder %s1751_s8, %s1751_s8 }
 0x7ac   :  { %v1041_v18 = vrot.slane %v1036_v16, %v1040_v15  ;;  %v1045_v19 = vrot.slane %v1036_v16, %v1044_v17  ;;  %p1758_p11 = por %p1757_p10, %p1756_p9 }
 0x7ae   :  { %p1759_p12 = pnand %p1758_p11, %p1752_p8 }
 0x864   :  { %v1162_v20 = vpop.f32.mrf.mxu0 }
 0x865   :  { %v1163_v21 = vadd.f32 %v1162_v20, %v1041_v18 }
 0x866   :  { %v1164_v22 = vpop.f32.mrf.mxu0 }
 0x867   :  { %v1169_v23 = vand.u32 2147483647, %v1163_v21  ;;  %v1165_v24 = vadd.f32 %v1164_v22, %v1045_v19  ;;  %vm1177_vm4 = vcmp.ge.f32.partialorder %v1163_v21, 0.0 }
 0x868   :  { %v1166_v25 = vpop.f32.mrf.mxu0 }
 0x869   :  { %v1171_v26 = vsub.f32 0.0, %v1169_v23  ;;  %v1170_v27 = vand.u32 2147483647, %v1165_v24  ;;  %vm1178_vm5 = vcmp.ge.f32.partialorder %v1165_v24, 0.0 }
 0x86a   :  { %v1167_v28 = vpop.f32.mrf.mxu0 }
 0x86b   :  { %v1173_v29 = vmul.f32 1.442695, %v1171_v26  ;;  %v1172_v30 = vsub.f32 0.0, %v1170_v27 }
 0x86d   :  { %1543 = vpow2.f32 %v1173_v29  ;;  %v1175_v31 = vmul.f32 1.442695, %v1172_v30 }
 0x86f   :  { %1545 = vpow2.f32 %v1175_v31 }
 0x87a   :  { %v1544_v32 = vpop.eup %1543 }
 0x87b   :  { %v1179_v33 = vadd.f32 1.0, %v1544_v32 }
 0x87c   :  { %v1546_v34 = vpop.eup %1545 }
 0x87d   :  { %1547 = vrcp.f32 %v1179_v33  ;;  %v1180_v35 = vadd.f32 1.0, %v1546_v34 }
 0x87f   :  { %1549 = vrcp.f32 %v1180_v35 }
 0x88a   :  { %v1548_v36 = vpop.eup %1547 }
 0x88b   :  { %v1185_v37 = vmul.f32 %v1548_v36, %v1544_v32 }
 0x88c   :  { %v1550_v38 = vpop.eup %1549 }
 0x88d   :  { %v1186_v39 = vmul.f32 %v1550_v38, %v1546_v34  ;;  %v1187_v40 = vsel %vm1177_vm4, %v1548_v36, %v1185_v37 }
 0x88e   :  { %1189 = vst [vmem:[#allocation17] sm:$0xff] %v1187_v40 }
 0x88f   :  { %v1188_v41 = vsel %vm1178_vm5, %v1550_v38, %v1186_v39 }
 0x890   :  { %1190 = vst [vmem:[#allocation17 + $0x8] sm:$0xff] %v1188_v41 }
 0x891   :  { %1762 = shalt.err (!%p1759_p12)
}
 0x892   :  { %1200 = dma.vmem_to_hbm [thread:$0]  %s1198_s22, 256, %s2211_s21, [#allocation4]  }
 0x893   :  { %1781 = dma.done.wait [#allocation4], 256  }
 0x894   :  { %1782 = vsyncadd [#allocation4], 4294967040 }
 0x895   :  { %1783 = dma.done.wait [#allocation19], 128  }
 0x896   :  { %1784 = vsyncadd [#allocation19], 4294967168 }
 0x897   :  { %1217 = vsyncpa [#allocation3], 1 }
 0x898   :  { %1218 = vsyncpa [#allocation6], 1 }
 0x899   :  { %1219 = vsyncpa [#allocation9], 1 }
 0x89a   :  { %1220 = vsyncpa [#allocation12], 1 }
 0x89b   :  { %1221 = vsyncpa [#allocation15], 1 }
 0x89c   :  { %1222 = vsyncpa [#allocation4], 1 }
 0x89d   :  { %1223 = vsyncpa [#allocation19], 1 }

</bundles_post_ra>
